<compile_context>
chip_gen: v7x
topology: tpu7x:2x2x1
jax: 0.10.0
libtpu: 0.0.40
codegen_flags: <defaults>
</compile_context>

<pallas_src>
import functools

import jax
import jax.numpy as jnp
from jax.experimental import pallas as pl
from jax.experimental.pallas import tpu as pltpu

HIDS = 128


def _cvae_kernel(
    # batch-tiled inputs
    x_ref, c_ref, eps_ref,
    # resident (pre-padded / fused) weights
    fc1_w, c1_w, d1_w, w2_ref, b1_ref, b2_ref, cshift_ref,
    # packed output: [x_recon | mu_z | var]
    out_ref,
    *, num_interv, dim, z_dim, approx_recip,
):
    f32 = jnp.float32
    L = dim + 2 * z_dim
    TB = x_ref.shape[0]

    def lrelu(v):
        return jnp.maximum(v, 0.2 * v)

    # Lane-region masks (VPU selects only; no cross-lane data movement anywhere below).
    lane = jax.lax.broadcasted_iota(jnp.int32, (TB, L), 1)
    is_x = lane < dim
    is_mu = (lane >= dim) & (lane < dim + z_dim)
    is_var = lane >= dim + z_dim

    b1 = b1_ref[...]            # (3, HIDS) : fc1 / c1 / d1 biases
    b2 = b2_ref[...]            # (3, L)    : mean&var / c2 / d2 biases (lane-padded)

    # ---- encode(x): mu @ A lands in the mu lanes, pre-softplus var in the var lanes ----
    h = lrelu(jnp.dot(x_ref[...], fc1_w[...], preferred_element_type=f32) + b1[0:1])
    mv = jnp.dot(h, w2_ref[0], preferred_element_type=f32) + b2[0:1]

    # ---- c_encode: intervention shift (zero outside the mu lanes by construction) ----
    interv = None
    if num_interv:
        stacked = (num_interv == 2) and (TB % 8 == 0)
        if num_interv == 1:
            c_parts = [c_ref[0]]                                     # (TB, c_dim)
        elif stacked:
            # free leading-dim collapse: both interventions in one matmul pass
            c_parts = [c_ref[...].reshape(2 * TB, c_ref.shape[2])]
        else:
            c_parts = [c_ref[0], c_ref[1]]
        for c_all in c_parts:
            hc = lrelu(jnp.dot(c_all, c1_w[...], preferred_element_type=f32) + b1[1:2])
            # logits live in the mu lanes; other lanes carry a -1e30 bias (temp folded in),
            # so the L-wide softmax equals softmax over the z real logits exactly.
            logits = jnp.dot(hc, w2_ref[1], preferred_element_type=f32) + b2[1:2]
            m = jnp.max(logits, axis=1, keepdims=True)
            e = jnp.exp(logits - m)
            denom = jnp.sum(e, axis=1, keepdims=True)
            inv = pl.reciprocal(denom, approx=True) if approx_recip else 1.0 / denom
            soft = e * inv
            s = jnp.sum(c_all * cshift_ref[...], axis=1, keepdims=True)   # c @ c_shift
            shift = soft * s                                              # bc * csz (padded)
            if shift.shape[0] != TB:          # stacked pass: fold the two row groups
                shift = shift[:TB, :] + shift[TB:, :]
            interv = shift if interv is None else interv + shift

    # ---- reverse_dag: softplus only the var lanes; mu lanes already hold mu @ A ----
    muvar = jnp.where(is_var, jax.nn.softplus(mv), mv)
    if interv is not None:
        muvar = muvar + interv                # mu lanes += interv; other lanes += 0

    # ---- reparametrize + dag: p = [0 | mu_z + interv | eps*sqrt(var)];
    #      d1_w has A^-1 @ W_d1 in both the mu- and var-row groups, so
    #      p @ d1_w == (z + interv) @ A^-1 @ W_d1 with no lane slicing.
    mu_branch = muvar if interv is None else muvar + interv
    p = jnp.where(is_mu, mu_branch, eps_ref[...] * jnp.sqrt(muvar))

    # ---- decode ----
    hd = lrelu(jnp.dot(p, d1_w[...], preferred_element_type=f32) + b1[2:3])
    xrec = lrelu(jnp.dot(hd, w2_ref[2], preferred_element_type=f32) + b2[2:3])

    # single lane-packed store: [x_recon | mu_z | var]
    out_ref[...] = jnp.where(is_x, xrec, muvar)


def _prep_kernel_params(params, temp):
    """Exact algebraic fusions + lane-offset padding of all weights (done once, outside)."""
    f32 = jnp.float32
    G = params["G"]
    z = G.shape[0]
    dim, hids = params["fc1_w"].shape
    L = dim + 2 * z

    A = jnp.eye(z, dtype=f32) - jnp.triu(G, k=1)
    Ainv = jnp.linalg.inv(A)          # tiny z x z inverse: plain-JAX glue, folded into d1

    # encode head -> lanes [dim, dim+z): mu @ A ; lanes [dim+z, L): pre-softplus var
    mv_w = jnp.concatenate(
        [jnp.zeros((hids, dim), f32), params["fc_mean_w"] @ A, params["fc_var_w"]], axis=1)
    mv_b = jnp.concatenate(
        [jnp.zeros((1, dim), f32), params["fc_mean_b"] @ A, params["fc_var_b"]], axis=1)

    # c head -> logits in the mu lanes; -1e30 bias elsewhere (=> exp underflows to 0, so the
    # L-wide softmax reduces exactly to the z-wide one).  temp is folded into the weights.
    neg = jnp.float32(-1e30)
    c2_w = jnp.concatenate(
        [jnp.zeros((hids, dim), f32), params["c2_w"] * temp, jnp.zeros((hids, z), f32)], axis=1)
    c2_b = jnp.concatenate(
        [jnp.full((1, dim), neg, f32), params["c2_b"] * temp, jnp.full((1, z), neg, f32)], axis=1)

    # decode: A^-1 folded into d1; mu- and var-row groups both map through it
    d1f = Ainv @ params["d1_w"]
    d1_big = jnp.concatenate([jnp.zeros((dim, hids), f32), d1f, d1f], axis=0)    # (L, hids)

    d2_w = jnp.concatenate([params["d2_w"], jnp.zeros((hids, 2 * z), f32)], axis=1)
    d2_b = jnp.concatenate([params["d2_b"], jnp.zeros((1, 2 * z), f32)], axis=1)

    return dict(
        fc1_w=params["fc1_w"],
        c1_w=params["c1_w"],
        d1_w=d1_big,
        w2=jnp.stack([mv_w, c2_w, d2_w]),                                        # (3, hids, L)
        b1=jnp.concatenate([params["fc1_b"], params["c1_b"], params["d1_b"]], axis=0),  # (3, hids)
        b2=jnp.concatenate([mv_b, c2_b, d2_b], axis=0),                          # (3, L)
        c_shift=params["c_shift"],
    )


def _round_up(n, m):
    return -(-n // m) * m


def _pick_batch_tile(B, cap):
    """Batch tile: big (default up to 1024 rows) so grid-step overhead amortizes, but with
    >= 2 grid steps whenever the batch allows so the "parallel" batch axis can shard across
    both TensorCores on v7x.  Always a multiple of 8 sublanes (or the whole batch if B<=8)."""
    cap = max(8, (int(cap) // 8) * 8)
    if B <= 8:
        return B                      # single step; block dim equals the full array dim
    tb = min(cap, _round_up(-(-B // 2), 8))
    return max(8, min(tb, _round_up(B, 8)))


def cvae_forward(params, x, c, c2, eps, num_interv=1, temp=1.0,
                 batch_tile=1024, approx_softmax_recip=True):
    """Pallas CVAE forward. Returns (x_recon, mu_z, var, G) like the torch module."""
    assert num_interv in (0, 1, 2)
    B, dim = x.shape
    z_dim = params["G"].shape[0]
    c_dim = c.shape[1]
    L = dim + 2 * z_dim

    kp = _prep_kernel_params(params, float(temp))

    TB = _pick_batch_tile(B, batch_tile)
    grid = (pl.cdiv(B, TB),)

    cstack = jnp.stack([c, c2])                                  # (2, B, c_dim)
    eps_packed = jnp.pad(eps, ((0, 0), (dim + z_dim, 0)))        # eps placed in the var lanes

    def row_spec(feat):
        return pl.BlockSpec((TB, feat), lambda i: (i, 0))

    def resident(arr):
        nd = arr.ndim
        return pl.BlockSpec(arr.shape, lambda i, _n=nd: (0,) * _n)

    weights = (kp["fc1_w"], kp["c1_w"], kp["d1_w"], kp["w2"], kp["b1"], kp["b2"], kp["c_shift"])

    kernel = functools.partial(_cvae_kernel, num_interv=num_interv, dim=dim,
                               z_dim=z_dim, approx_recip=approx_softmax_recip)

    out = pl.pallas_call(
        kernel,
        grid=grid,
        out_shape=jax.ShapeDtypeStruct((B, L), jnp.float32),
        in_specs=[row_spec(dim),
                  pl.BlockSpec((2, TB, c_dim), lambda i: (0, i, 0)),
                  row_spec(L)] + [resident(w) for w in weights],
        out_specs=row_spec(L),
        compiler_params=pltpu.CompilerParams(
            dimension_semantics=("parallel",),
            # per-step footprint is a few hundred KiB at TB=1024 -> default scoped VMEM is plenty
        ),
    )(x, cstack, eps_packed, *weights)

    x_recon = out[:, :dim]
    mu_z = out[:, dim:dim + z_dim]
    var = out[:, dim + z_dim:]
    return x_recon, mu_z, var, params["G"]


def init_params(key, dim, z_dim, c_dim):
    """Deterministic synthetic init mirroring the module's parameter shapes.
    Linear weights stored as (in, out); biases as (1, out)."""
    ks = jax.random.split(key, 8)

    def lin(k, n_in, n_out, std=0.02):
        return (jax.random.normal(k, (n_in, n_out), jnp.float32) * std,
                jnp.zeros((1, n_out), jnp.float32))

    p = {}
    p["fc1_w"], p["fc1_b"] = lin(ks[0], dim, HIDS)
    p["fc_mean_w"], p["fc_mean_b"] = lin(ks[1], HIDS, z_dim)
    p["fc_var_w"], p["fc_var_b"] = lin(ks[2], HIDS, z_dim)
    p["c1_w"], p["c1_b"] = lin(ks[3], c_dim, HIDS)
    p["c2_w"], p["c2_b"] = lin(ks[4], HIDS, z_dim)
    p["d1_w"], p["d1_b"] = lin(ks[5], z_dim, HIDS)
    p["d2_w"], p["d2_b"] = lin(ks[6], HIDS, dim)
    p["G"] = jax.random.normal(ks[7], (z_dim, z_dim), jnp.float32) * 0.1
    p["c_shift"] = jnp.ones((1, c_dim), jnp.float32)
    return p


def _reference_forward(params, x, c, c2, eps, num_interv=1, temp=1.0):
    """Pure-JAX, unfused reference mirroring the torch module (checks all weight fusions)."""
    def lrelu(v):
        return jnp.where(v >= 0, v, 0.2 * v)

    def lin(v, w, b):
        return v @ w + b

    z_dim = params["G"].shape[0]
    A = jnp.eye(z_dim) - jnp.triu(params["G"], k=1)
    Ainv = jnp.linalg.inv(A)

    def c_encode(c_in):
        h = lrelu(lin(c_in, params["c1_w"], params["c1_b"]))
        bc = jax.nn.softmax(lin(h, params["c2_w"], params["c2_b"]) * temp, axis=1)
        s = jnp.sum(c_in * params["c_shift"], axis=1, keepdims=True)
        return bc, s

    bc, csz = c_encode(c)
    bc2, csz2 = c_encode(c2)

    h = lrelu(lin(x, params["fc1_w"], params["fc1_b"]))
    mu = lin(h, params["fc_mean_w"], params["fc_mean_b"])
    var = jax.nn.softplus(lin(h, params["fc_var_w"], params["fc_var_b"]))

    mu_z = mu @ A
    if num_interv == 1:
        mu_z = mu_z + bc * csz
    elif num_interv == 2:
        mu_z = mu_z + bc * csz + bc2 * csz2

    z = eps * jnp.sqrt(var) + mu_z
    if num_interv == 0:
        zi = z
    elif num_interv == 1:
        zi = z + bc * csz
    else:
        zi = z + bc * csz + bc2 * csz2
    u = zi @ Ainv

    hd = lrelu(lin(u, params["d1_w"], params["d1_b"]))
    x_recon = lrelu(lin(hd, params["d2_w"], params["d2_b"]))
    return x_recon, mu_z, var, params["G"]


if __name__ == "__main__":
    B, DIM, Z_DIM, C_DIM = 2, 16, 8, 4

    key = jax.random.PRNGKey(0)
    k_p, k_x, k_c, k_c2, k_eps = jax.random.split(key, 5)

    params = init_params(k_p, DIM, Z_DIM, C_DIM)
    x = jax.random.normal(k_x, (B, DIM), jnp.float32)
    c = jax.random.normal(k_c, (B, C_DIM), jnp.float32)
    c2 = jax.random.normal(k_c2, (B, C_DIM), jnp.float32)
    # reparametrization noise is an explicit input (deterministic under PRNGKey(0))
    eps = jax.random.normal(k_eps, (B, Z_DIM), jnp.float32)

    # Exact-divide softmax path: validates the DAG/temp/lane-padding fusions at tight tolerance.
    for ni in (0, 1, 2):
        for temp in (1.0, 0.7):
            got = cvae_forward(params, x, c, c2, eps, num_interv=ni, temp=temp,
                               approx_softmax_recip=False)
            jax.block_until_ready(got)
            want = _reference_forward(params, x, c, c2, eps, num_interv=ni, temp=temp)
            for g, w in zip(got, want):
                assert jnp.allclose(g, w, atol=1e-5, rtol=1e-5), \
                    f"mismatch (num_interv={ni}, temp={temp})"

    # Default fast path (approximate EUP reciprocal in the softmax): looser tolerance.
    got = cvae_forward(params, x, c, c2, eps, num_interv=2, temp=1.0)
    jax.block_until_ready(got)
    want = _reference_forward(params, x, c, c2, eps, num_interv=2, temp=1.0)
    for g, w in zip(got, want):
        assert jnp.allclose(g, w, atol=5e-3, rtol=5e-3), "approx-recip mismatch"

    # Multi-step grid with a partial final block (B % TB != 0) and the stacked-c path (TB % 8 == 0).
    B2 = 20
    kx2, kca, kcb, ke2 = jax.random.split(jax.random.PRNGKey(1), 4)
    x2 = jax.random.normal(kx2, (B2, DIM), jnp.float32)
    ca = jax.random.normal(kca, (B2, C_DIM), jnp.float32)
    cb = jax.random.normal(kcb, (B2, C_DIM), jnp.float32)
    e2 = jax.random.normal(ke2, (B2, Z_DIM), jnp.float32)
    for ni in (0, 1, 2):
        got = cvae_forward(params, x2, ca, cb, e2, num_interv=ni, temp=1.0,
                           batch_tile=8, approx_softmax_recip=False)
        jax.block_until_ready(got)
        want = _reference_forward(params, x2, ca, cb, e2, num_interv=ni, temp=1.0)
        for g, w in zip(got, want):
            assert jnp.allclose(g, w, atol=1e-5, rtol=1e-5), f"tiled mismatch (num_interv={ni})"

    print("KERNEL_OK")
</pallas_src>

<mosaic_0001>
module attributes {stable_mosaic.version = 11 : i64} {
  func.func @_cvae_kernel(%arg0: i32, %arg1: memref<2x16xf32, #tpu.memory_space<vmem>>, %arg2: memref<2x2x4xf32, #tpu.memory_space<vmem>>, %arg3: memref<2x32xf32, #tpu.memory_space<vmem>>, %arg4: memref<16x128xf32, #tpu.memory_space<vmem>>, %arg5: memref<4x128xf32, #tpu.memory_space<vmem>>, %arg6: memref<32x128xf32, #tpu.memory_space<vmem>>, %arg7: memref<3x128x32xf32, #tpu.memory_space<vmem>>, %arg8: memref<3x128xf32, #tpu.memory_space<vmem>>, %arg9: memref<3x32xf32, #tpu.memory_space<vmem>>, %arg10: memref<1x4xf32, #tpu.memory_space<vmem>>, %arg11: memref<2x32xf32, #tpu.memory_space<vmem>>) attributes {dimension_semantics = [#tpu.dimension_semantics<parallel>], iteration_bounds = array<i64: 1>, scalar_prefetch = 0 : i64, scratch_operands = 0 : i64, tpu.core_type = #tpu.core_type<tc>, window_params = [{transform_indices = @transform_0, window_bounds = array<i64: 2, 16>}, {transform_indices = @transform_1, window_bounds = array<i64: 2, 2, 4>}, {transform_indices = @transform_2, window_bounds = array<i64: 2, 32>}, {pipeline_mode = #tpu.pipeline_mode<synchronous>, transform_indices = @transform_3, window_bounds = array<i64: 16, 128>}, {pipeline_mode = #tpu.pipeline_mode<synchronous>, transform_indices = @transform_4, window_bounds = array<i64: 4, 128>}, {pipeline_mode = #tpu.pipeline_mode<synchronous>, transform_indices = @transform_5, window_bounds = array<i64: 32, 128>}, {pipeline_mode = #tpu.pipeline_mode<synchronous>, transform_indices = @transform_6, window_bounds = array<i64: 3, 128, 32>}, {pipeline_mode = #tpu.pipeline_mode<synchronous>, transform_indices = @transform_7, window_bounds = array<i64: 3, 128>}, {pipeline_mode = #tpu.pipeline_mode<synchronous>, transform_indices = @transform_8, window_bounds = array<i64: 3, 32>}, {pipeline_mode = #tpu.pipeline_mode<synchronous>, transform_indices = @transform_9, window_bounds = array<i64: 1, 4>}, {transform_indices = @transform_10, window_bounds = array<i64: 2, 32>}]} {
    %0 = tpu.iota {dimensions = array<i32: 1>} : vector<2x32xi32>
    %c16_i32 = arith.constant 16 : i32
    %1 = vector.broadcast %c16_i32 : i32 to vector<2x32xi32>
    %2 = arith.cmpi slt, %0, %1 : vector<2x32xi32>
    %c16_i32_0 = arith.constant 16 : i32
    %3 = vector.broadcast %c16_i32_0 : i32 to vector<2x32xi32>
    %4 = arith.cmpi sge, %0, %3 : vector<2x32xi32>
    %c24_i32 = arith.constant 24 : i32
    %5 = vector.broadcast %c24_i32 : i32 to vector<2x32xi32>
    %6 = arith.cmpi slt, %0, %5 : vector<2x32xi32>
    %7 = arith.andi %4, %6 : vector<2x32xi1>
    %c24_i32_1 = arith.constant 24 : i32
    %8 = vector.broadcast %c24_i32_1 : i32 to vector<2x32xi32>
    %9 = arith.cmpi sge, %0, %8 : vector<2x32xi32>
    %c0 = arith.constant 0 : index
    %c0_2 = arith.constant 0 : index
    %10 = vector.load %arg8[%c0, %c0_2] : memref<3x128xf32, #tpu.memory_space<vmem>>, vector<3x128xf32>
    %c0_3 = arith.constant 0 : index
    %c0_4 = arith.constant 0 : index
    %11 = vector.load %arg9[%c0_3, %c0_4] : memref<3x32xf32, #tpu.memory_space<vmem>>, vector<3x32xf32>
    %c0_5 = arith.constant 0 : index
    %c0_6 = arith.constant 0 : index
    %12 = vector.load %arg1[%c0_5, %c0_6] : memref<2x16xf32, #tpu.memory_space<vmem>>, vector<2x16xf32>
    %c0_7 = arith.constant 0 : index
    %c0_8 = arith.constant 0 : index
    %13 = vector.load %arg4[%c0_7, %c0_8] : memref<16x128xf32, #tpu.memory_space<vmem>>, vector<16x128xf32>
    %cst = arith.constant dense<0.000000e+00> : vector<2x128xf32>
    %14 = tpu.matmul %12, %13, %cst {dimension_numbers = #tpu.dot_dimension_numbers<[1], [0], [0], [1], [0, 0, 1, 1], [], []>} : vector<2x16xf32>, vector<16x128xf32>, vector<2x128xf32> -> vector<2x128xf32>
    %15 = vector.extract_strided_slice %10 {offsets = [0, 0], sizes = [1, 128], strides = [1, 1]} : vector<3x128xf32> to vector<1x128xf32>
    %16 = vector.broadcast %15 : vector<1x128xf32> to vector<2x128xf32>
    %17 = arith.addf %14, %16 : vector<2x128xf32>
    %cst_9 = arith.constant 2.000000e-01 : f32
    %18 = vector.broadcast %cst_9 : f32 to vector<2x128xf32>
    %19 = arith.mulf %18, %17 : vector<2x128xf32>
    %20 = arith.maximumf %17, %19 : vector<2x128xf32>
    %c0_10 = arith.constant 0 : index
    %c0_11 = arith.constant 0 : index
    %c0_12 = arith.constant 0 : index
    %21 = vector.load %arg7[%c0_10, %c0_11, %c0_12] : memref<3x128x32xf32, #tpu.memory_space<vmem>>, vector<1x128x32xf32>
    %22 = vector.shape_cast %21 : vector<1x128x32xf32> to vector<128x32xf32>
    %cst_13 = arith.constant dense<0.000000e+00> : vector<2x32xf32>
    %23 = tpu.matmul %20, %22, %cst_13 {dimension_numbers = #tpu.dot_dimension_numbers<[1], [0], [0], [1], [0, 0, 1, 1], [], []>} : vector<2x128xf32>, vector<128x32xf32>, vector<2x32xf32> -> vector<2x32xf32>
    %24 = vector.extract_strided_slice %11 {offsets = [0, 0], sizes = [1, 32], strides = [1, 1]} : vector<3x32xf32> to vector<1x32xf32>
    %25 = vector.broadcast %24 : vector<1x32xf32> to vector<2x32xf32>
    %26 = arith.addf %23, %25 : vector<2x32xf32>
    %cst_14 = arith.constant 0.000000e+00 : f32
    %27 = vector.broadcast %cst_14 : f32 to vector<2x32xf32>
    %28 = arith.maximumf %26, %27 : vector<2x32xf32>
    %29 = vector.broadcast %cst_14 : f32 to vector<2x32xf32>
    %30 = arith.subf %26, %29 : vector<2x32xf32>
    %31 = arith.cmpf one, %30, %30 : vector<2x32xf32>
    %32 = vector.broadcast %cst_14 : f32 to vector<2x32xf32>
    %33 = arith.addf %26, %32 : vector<2x32xf32>
    %34 = math.absf %30 : vector<2x32xf32>
    %cst_15 = arith.constant 0.000000e+00 : f32
    %35 = vector.broadcast %cst_15 : f32 to vector<2x32xf32>
    %36 = arith.subf %35, %34 : vector<2x32xf32>
    %37 = math.exp %36 : vector<2x32xf32>
    %38 = math.log1p %37 : vector<2x32xf32>
    %39 = arith.addf %28, %38 : vector<2x32xf32>
    %40 = arith.select %31, %33, %39 : vector<2x32xi1>, vector<2x32xf32>
    %41 = arith.select %9, %40, %26 : vector<2x32xi1>, vector<2x32xf32>
    %c0_16 = arith.constant 0 : index
    %c0_17 = arith.constant 0 : index
    %42 = vector.load %arg3[%c0_16, %c0_17] : memref<2x32xf32, #tpu.memory_space<vmem>>, vector<2x32xf32>
    %43 = math.sqrt %41 : vector<2x32xf32>
    %44 = arith.mulf %42, %43 : vector<2x32xf32>
    %45 = arith.select %7, %41, %44 : vector<2x32xi1>, vector<2x32xf32>
    %c0_18 = arith.constant 0 : index
    %c0_19 = arith.constant 0 : index
    %46 = vector.load %arg6[%c0_18, %c0_19] : memref<32x128xf32, #tpu.memory_space<vmem>>, vector<32x128xf32>
    %cst_20 = arith.constant dense<0.000000e+00> : vector<2x128xf32>
    %47 = tpu.matmul %45, %46, %cst_20 {dimension_numbers = #tpu.dot_dimension_numbers<[1], [0], [0], [1], [0, 0, 1, 1], [], []>} : vector<2x32xf32>, vector<32x128xf32>, vector<2x128xf32> -> vector<2x128xf32>
    %48 = vector.extract_strided_slice %10 {offsets = [2, 0], sizes = [1, 128], strides = [1, 1]} : vector<3x128xf32> to vector<1x128xf32>
    %49 = vector.broadcast %48 : vector<1x128xf32> to vector<2x128xf32>
    %50 = arith.addf %47, %49 : vector<2x128xf32>
    %cst_21 = arith.constant 2.000000e-01 : f32
    %51 = vector.broadcast %cst_21 : f32 to vector<2x128xf32>
    %52 = arith.mulf %51, %50 : vector<2x128xf32>
    %53 = arith.maximumf %50, %52 : vector<2x128xf32>
    %c2 = arith.constant 2 : index
    %c0_22 = arith.constant 0 : index
    %c0_23 = arith.constant 0 : index
    %54 = vector.load %arg7[%c2, %c0_22, %c0_23] : memref<3x128x32xf32, #tpu.memory_space<vmem>>, vector<1x128x32xf32>
    %55 = vector.shape_cast %54 : vector<1x128x32xf32> to vector<128x32xf32>
    %cst_24 = arith.constant dense<0.000000e+00> : vector<2x32xf32>
    %56 = tpu.matmul %53, %55, %cst_24 {dimension_numbers = #tpu.dot_dimension_numbers<[1], [0], [0], [1], [0, 0, 1, 1], [], []>} : vector<2x128xf32>, vector<128x32xf32>, vector<2x32xf32> -> vector<2x32xf32>
    %57 = vector.extract_strided_slice %11 {offsets = [2, 0], sizes = [1, 32], strides = [1, 1]} : vector<3x32xf32> to vector<1x32xf32>
    %58 = vector.broadcast %57 : vector<1x32xf32> to vector<2x32xf32>
    %59 = arith.addf %56, %58 : vector<2x32xf32>
    %cst_25 = arith.constant 2.000000e-01 : f32
    %60 = vector.broadcast %cst_25 : f32 to vector<2x32xf32>
    %61 = arith.mulf %60, %59 : vector<2x32xf32>
    %62 = arith.maximumf %59, %61 : vector<2x32xf32>
    %63 = arith.select %2, %62, %41 : vector<2x32xi1>, vector<2x32xf32>
    %c0_26 = arith.constant 0 : index
    %c0_27 = arith.constant 0 : index
    %64 = vector.load %arg11[%c0_26, %c0_27] : memref<2x32xf32, #tpu.memory_space<vmem>>, vector<2x32xf32>
    tpu.vector_store %arg11[%c0_26, %c0_27], %63 {strides = array<i32>} : memref<2x32xf32, #tpu.memory_space<vmem>>, vector<2x32xf32>,
    return
  }
  func.func @transform_0(%arg0: i32) -> (i32, i32) {
    %c0_i32 = arith.constant 0 : i32
    %c0_i32_0 = arith.constant 0 : i32
    return %arg0, %c0_i32 : i32, i32
  }
  func.func @transform_1(%arg0: i32) -> (i32, i32, i32) {
    %c0_i32 = arith.constant 0 : i32
    %c0_i32_0 = arith.constant 0 : i32
    %c0_i32_1 = arith.constant 0 : i32
    return %c0_i32, %arg0, %c0_i32_0 : i32, i32, i32
  }
  func.func @transform_2(%arg0: i32) -> (i32, i32) {
    %c0_i32 = arith.constant 0 : i32
    %c0_i32_0 = arith.constant 0 : i32
    return %arg0, %c0_i32 : i32, i32
  }
  func.func @transform_3(%arg0: i32) -> (i32, i32) {
    %c0_i32 = arith.constant 0 : i32
    %c0_i32_0 = arith.constant 0 : i32
    %c0_i32_1 = arith.constant 0 : i32
    return %c0_i32, %c0_i32_0 : i32, i32
  }
  func.func @transform_4(%arg0: i32) -> (i32, i32) {
    %c0_i32 = arith.constant 0 : i32
    %c0_i32_0 = arith.constant 0 : i32
    %c0_i32_1 = arith.constant 0 : i32
    return %c0_i32, %c0_i32_0 : i32, i32
  }
  func.func @transform_5(%arg0: i32) -> (i32, i32) {
    %c0_i32 = arith.constant 0 : i32
    %c0_i32_0 = arith.constant 0 : i32
    %c0_i32_1 = arith.constant 0 : i32
    return %c0_i32, %c0_i32_0 : i32, i32
  }
  func.func @transform_6(%arg0: i32) -> (i32, i32, i32) {
    %c0_i32 = arith.constant 0 : i32
    %c0_i32_0 = arith.constant 0 : i32
    %c0_i32_1 = arith.constant 0 : i32
    %c0_i32_2 = arith.constant 0 : i32
    return %c0_i32, %c0_i32_0, %c0_i32_1 : i32, i32, i32
  }
  func.func @transform_7(%arg0: i32) -> (i32, i32) {
    %c0_i32 = arith.constant 0 : i32
    %c0_i32_0 = arith.constant 0 : i32
    %c0_i32_1 = arith.constant 0 : i32
    return %c0_i32, %c0_i32_0 : i32, i32
  }
  func.func @transform_8(%arg0: i32) -> (i32, i32) {
    %c0_i32 = arith.constant 0 : i32
    %c0_i32_0 = arith.constant 0 : i32
    %c0_i32_1 = arith.constant 0 : i32
    return %c0_i32, %c0_i32_0 : i32, i32
  }
  func.func @transform_9(%arg0: i32) -> (i32, i32) {
    %c0_i32 = arith.constant 0 : i32
    %c0_i32_0 = arith.constant 0 : i32
    %c0_i32_1 = arith.constant 0 : i32
    return %c0_i32, %c0_i32_0 : i32, i32
  }
  func.func @transform_10(%arg0: i32) -> (i32, i32) {
    %c0_i32 = arith.constant 0 : i32
    %c0_i32_0 = arith.constant 0 : i32
    return %arg0, %c0_i32 : i32, i32
  }
}

</mosaic_0001>

<bundles_post_ra>
// kernel: tpu_custom_call.1
= control target key start
LH: loop header
LB: loop body
LE: loop exit
PB: predicated region body
PF: predicated region fallthrough
CT: control target
= control target key end

     0   :  { %v680_v2 = vmov 0.0|0.0   ;;  %vm681_vm0 = vmmov 0   ;;  %v682_v4 = vmov 0.0   ;;  %vm52_vm1 = vcmask 130048   ;;  %s932_s0 = inlined_call_operand.vmem [shape: f32[2,16], index: 0, kind: input, shape index: {}]   ;;  %s933_s1 = inlined_call_operand.vmem [shape: f32[2,2,4], index: 1, kind: input, shape index: {}]   ;;  %s934_s2 = inlined_call_operand.vmem [shape: f32[2,32], index: 2, kind: input, shape index: {}]   ;;  %s935_s3 = inlined_call_operand.vmem [shape: f32[16,128], index: 3, kind: input, shape index: {}]   ;;  %s936_s4 = inlined_call_operand.vmem [shape: f32[4,128], index: 4, kind: input, shape index: {}]   ;;  %s937_s5 = inlined_call_operand.vmem [shape: f32[32,128], index: 5, kind: input, shape index: {}]   ;;  %s938_s6 = inlined_call_operand.vmem [shape: f32[3,128,32], index: 6, kind: input, shape index: {}]   ;;  %s939_s7 = inlined_call_operand.vmem [shape: f32[3,128], index: 7, kind: input, shape index: {}]   ;;  %s940_s8 = inlined_call_operand.vmem [shape: f32[3,32], index: 8, kind: input, shape index: {}]   ;;  %s941_s9 = inlined_call_operand.vmem [shape: f32[1,4], index: 9, kind: input, shape index: {}]   ;;  %s942_s10 = inlined_call_operand.hbm [shape: f32[2,32], index: 10, kind: output, shape index: {}]  }
   0x1   :  { %v46_v0 = vld [vmem:[%s935_s3] sm:$0xff]  ;;  %v47_v1 = vld [vmem:[%s935_s3 + $0x8] sm:$0xff]  ;;  %589 = vmatprep.subr.bf16.mxu1 %v680_v2  ;;  %505 = vmatprep.mubr.msk.f32.mxu1 %vm681_vm0, %v682_v4  ;;  %v130_v9 = vld [vmem:[%s938_s6 + $0x10] sm:$0xff] }
   0x2   :  { %v590_v3 = vpack.c.bf16 %v47_v1, %v46_v0  ;;  %v128_v5 = vld [vmem:[%s938_s6] sm:$0xff]  ;;  %v129_v6 = vld [vmem:[%s938_s6 + $0x8] sm:$0xff]  ;;  %616 = vmatprep.subr.bf16.mxu0 %v680_v2  ;;  %551 = vmatprep.mubr.msk.f32.mxu0 %vm681_vm0, %v682_v4  ;;  %v131_v10 = vld [vmem:[%s938_s6 + $0x18] sm:$0xff] }
   0x3   :  { %v45_v7 = vld [vmem:[%s932_s0] sm:$0x3]  ;;  %v593_v8 = vpack.c.bf16 %v129_v6, %v128_v5 }
   0x4   :  { %591 = vmatpush3.bf16.msra.mxu1 %v590_v3 }
   0x5   :  { %592 = vmatprep.subr.bf16.mxu1 %v680_v2 }
   0x6   :  { %15 = vsyncpa [#allocation3], 0  ;;  %v596_v11 = vpack.c.bf16 %v131_v10, %v130_v9  ;;  %v132_v12 = vld [vmem:[%s938_s6 + $0x20] sm:$0xff]  ;;  %v133_v13 = vld [vmem:[%s938_s6 + $0x28] sm:$0xff]  ;;  %v36_v30 = vlaneseq  ;;  %vm255_vm10 = vcmask 261120   ;;  %s683_s13 = smov [#allocation2]  }
   0x7   :  { %506 = vmatmul.mubr.msk.f32.vlgmr.msra.gmra.mrb[0].mxu1 %vm52_vm1, %v45_v7  ;;  %v599_v14 = vpack.c.bf16 %v133_v13, %v132_v12  ;;  %v134_v15 = vld [vmem:[%s938_s6 + $0x30] sm:$0xff]  ;;  %v135_v16 = vld [vmem:[%s938_s6 + $0x38] sm:$0xff]  ;;  %v136_v18 = vld [vmem:[%s938_s6 + $0x40] sm:$0xff]  ;;  %vm425_vm12 = vcmask 254976  }
   0x8   :  { %594 = vmatpush3.bf16.msra.mxu1 %v593_v8  ;;  %540 = vmatprep.mubr.msk.f32.mxu1 %vm681_vm0, %v682_v4  ;;  %v602_v17 = vpack.c.bf16 %v135_v16, %v134_v15  ;;  %v137_v19 = vld [vmem:[%s938_s6 + $0x48] sm:$0xff]  ;;  %v138_v21 = vld [vmem:[%s938_s6 + $0x50] sm:$0xff]  ;;  %v139_v22 = vld [vmem:[%s938_s6 + $0x58] sm:$0xff]  ;;  %v812_v31 = vshrl.u32 %v36_v30, 7  ;;  %v841_v60 = vand.u32 127, %v36_v30 }
   0x9   :  { %595 = vmatprep.subr.bf16.mxu1 %v680_v2  ;;  %v605_v20 = vpack.c.bf16 %v137_v19, %v136_v18  ;;  %v608_v23 = vpack.c.bf16 %v139_v22, %v138_v21  ;;  %v140_v24 = vld [vmem:[%s938_s6 + $0x60] sm:$0xff]  ;;  %v141_v25 = vld [vmem:[%s938_s6 + $0x68] sm:$0xff]  ;;  %v142_v27 = vld [vmem:[%s938_s6 + $0x70] sm:$0xff] }
   0xa   :  { %v611_v26 = vpack.c.bf16 %v141_v25, %v140_v24  ;;  %v143_v28 = vld [vmem:[%s938_s6 + $0x78] sm:$0xff]  ;;  %v50_v32 = vsub.s32 0, %v812_v31  ;;  %v818_v33 = vld [vmem:[%s939_s7] sm:$0x7]  ;;  %v248_v41 = vld [vmem:[%s937_s5 + $0x8] sm:$0xff]  ;;  %vm42_vm3 = vcmp.ge.s32.totalorder %v841_v60, 24 }
   0xb   :  { %v614_v29 = vpack.c.bf16 %v143_v28, %v142_v27  ;;  %v247_v40 = vld [vmem:[%s937_s5] sm:$0xff]  ;;  %v249_v42 = vld [vmem:[%s937_s5 + $0x10] sm:$0xff]  ;;  %v250_v44 = vld [vmem:[%s937_s5 + $0x18] sm:$0xff]  ;;  %vm39_vm5 = vcmp.ge.s32.totalorder %v841_v60, 16  ;;  %vm40_vm6 = vcmp.lt.s32.totalorder %v841_v60, 24  ;;  %vm38_vm11 = vcmp.lt.s32.totalorder %v841_v60, 16 }
   0xc   :  { %597 = vmatpush3.bf16.msra.mxu1 %v596_v11  ;;  %v51_v34 = vrot.slane %v818_v33, %v50_v32  ;;  %v617_v43 = vpack.c.bf16 %v248_v41, %v247_v40  ;;  %v620_v45 = vpack.c.bf16 %v250_v44, %v249_v42  ;;  %v838_v46 = vld [vmem:[%s940_s8] sm:$0x7]  ;;  %v444_v11 = vld [vmem:[%s938_s6 + $0x108] sm:$0xff]  ;;  %vm41_vm9 = vmand %vm39_vm5, %vm40_vm6 }
   0xd   :  { %598 = vmatprep.subr.bf16.mxu1 %v680_v2  ;;  %v147_v47 = vrot.slane %v838_v46, %v50_v32  ;;  %v237_v8 = vld [vmem:[%s934_s2] sm:$0x3]  ;;  %v445_v16 = vld [vmem:[%s938_s6 + $0x110] sm:$0xff]  ;;  %v448_v21 = vld [vmem:[%s938_s6 + $0x128] sm:$0xff] }
   0xe   :  { %618 = vmatpush3.bf16.msra.mxu0 %v617_v43  ;;  %v443_v10 = vld [vmem:[%s938_s6 + $0x100] sm:$0xff]  ;;  %v453_v28 = vld [vmem:[%s938_s6 + $0x150] sm:$0xff] }
   0xf   :  { %619 = vmatprep.subr.bf16.mxu0 %v680_v2  ;;  %v623_v15 = vpack.c.bf16 %v444_v11, %v443_v10  ;;  %v451_v25 = vld [vmem:[%s938_s6 + $0x140] sm:$0xff] }
  0x10   :  { %600 = vmatpush3.bf16.msra.mxu1 %v599_v14  ;;  %v455_v32 = vld [vmem:[%s938_s6 + $0x160] sm:$0xff] }
  0x11   :  { %601 = vmatprep.subr.bf16.mxu1 %v680_v2 }
  0x12   :  { %621 = vmatpush3.bf16.msra.mxu0 %v620_v45 }
  0x13   :  { %622 = vmatprep.subr.bf16.mxu0 %v680_v2 }
  0x14   :  { %603 = vmatpush3.bf16.msra.mxu1 %v602_v17  ;;  %v446_v17 = vld [vmem:[%s938_s6 + $0x118] sm:$0xff] }
  0x15   :  { %604 = vmatprep.subr.bf16.mxu1 %v680_v2  ;;  %v626_v19 = vpack.c.bf16 %v446_v17, %v445_v16 }
  0x18   :  { %606 = vmatpush3.bf16.msra.mxu1 %v605_v20  ;;  %v447_v20 = vld [vmem:[%s938_s6 + $0x120] sm:$0xff] }
  0x19   :  { %607 = vmatprep.subr.bf16.mxu1 %v680_v2  ;;  %v629_v22 = vpack.c.bf16 %v448_v21, %v447_v20 }
  0x1c   :  { %609 = vmatpush3.bf16.msra.mxu1 %v608_v23  ;;  %v449_v23 = vld [vmem:[%s938_s6 + $0x130] sm:$0xff] }
  0x1d   :  { %610 = vmatprep.subr.bf16.mxu1 %v680_v2 }
  0x20   :  { %612 = vmatpush3.bf16.msra.mxu1 %v611_v26  ;;  %v452_v26 = vld [vmem:[%s938_s6 + $0x148] sm:$0xff] }
  0x21   :  { %613 = vmatprep.subr.bf16.mxu1 %v680_v2  ;;  %v635_v27 = vpack.c.bf16 %v452_v26, %v451_v25 }
  0x24   :  { %615 = vmatpush3.bf16.msra.mxu1 %v614_v29  ;;  %v454_v29 = vld [vmem:[%s938_s6 + $0x158] sm:$0xff] }
  0x25   :  { %v638_v30 = vpack.c.bf16 %v454_v29, %v453_v28 }
  0xda   :  { %v122_v35 = vpop.f32.mrb[0].mxu1 }
  0xdb   :  { %v123_v36 = vadd.f32 %v122_v35, %v51_v34  ;;  %v507_v37 = vpop.f32.mrb[1].mxu1  ;;  %v456_v34 = vld [vmem:[%s938_s6 + $0x168] sm:$0xff] }
  0xdc   :  { %v641_v35 = vpack.c.bf16 %v456_v34, %v455_v32  ;;  %v458_v37 = vld [vmem:[%s938_s6 + $0x178] sm:$0xff] }
  0xdd   :  { %v126_v38 = vmul.f32 0.2, %v123_v36 }
  0xdf   :  { %v127_v39 = vmax.f32 %v123_v36, %v126_v38  ;;  %v457_v36 = vld [vmem:[%s938_s6 + $0x170] sm:$0xff] }
  0xe0   :  { %v644_v38 = vpack.c.bf16 %v458_v37, %v457_v36 }
  0xe1   :  { %541 = vmatmul.mubr.f32.vlgmr.msra.gmra.mrb[2].mxu1 %v127_v39  ;;  %v253_v39 = vsub.s32 2, %v812_v31 }
  0xe3   :  { %v254_v40 = vrot.slane %v818_v33, %v253_v39 }
 0x1b4   :  { %v214_v48 = vpop.f32.mrb[2].mxu1 }
 0x1b5   :  { %v215_v49 = vadd.f32 %v214_v48, %v147_v47  ;;  %v542_v50 = vpop.f32.mrb[3].mxu1 }
 0x1b7   :  { %v221_v51 = vand.u32 2147483647, %v215_v49  ;;  %v218_v63 = vmax.f32 %v215_v49, 0.0  ;;  %vm219_vm4 = vcmp.ne.f32.partialorder %v215_v49, %v215_v49 }
 0x1b9   :  { %v222_v52 = vsub.f32 0.0, %v221_v51 }
 0x1bb   :  { %v223_v53 = vmul.f32 1.442695, %v222_v52 }
 0x1bd   :  { %650 = vpow2.f32 %v223_v53 }
 0x1c7   :  { %v651_v54 = vpop.eup %650 }
 0x1c8   :  { %v225_v55 = vadd.f32 1.0, %v651_v54  ;;  %v228_v56 = vmul.f32 -0.5, %v651_v54  ;;  %v231_v58 = vand.u32 2147483647, %v651_v54 }
 0x1ca   :  { %652 = vlog2.f32 %v225_v55  ;;  %v229_v57 = vadd.f32 1.0, %v228_v56  ;;  %vm232_vm2 = vcmp.lt.f32.partialorder %v231_v58, 0.0004427343 }
 0x1cc   :  { %v230_v62 = vmul.f32 %v651_v54, %v229_v57 }
 0x1d4   :  { %v653_v59 = vpop.eup %652 }
 0x1d5   :  { %v227_v61 = vmul.f32 0.6931472, %v653_v59 }
 0x1d7   :  { %v233_v0 = vsel %vm232_vm2, %v230_v62, %v227_v61 }
 0x1d8   :  { %v234_v1 = vadd.f32 %v233_v0, %v218_v63 }
 0x1da   :  { %v235_v3 = vsel %vm219_vm4, %v215_v49, %v234_v1 }
 0x1db   :  { %v844_v5 = vsel %vm42_vm3, %v235_v3, %v215_v49 }
 0x1dc   :  { %654 = vrsqrt.f32 %v844_v5  ;;  %vm240_vm7 = vcmp.eq.f32.partialorder %v844_v5, inf  ;;  %v243_v9 = vand.u32 2147483648, %v844_v5  ;;  %vm242_vm8 = vcmp.eq.f32.partialorder %v844_v5, 0.0 }
 0x1e6   :  { %v655_v6 = vpop.eup %654 }
 0x1e7   :  { %v239_v7 = vmul.f32 %v655_v6, %v844_v5 }
 0x1e9   :  { %v241_v12 = vsel %vm240_vm7, %v844_v5, %v239_v7 }
 0x1ea   :  { %v244_v13 = vsel %vm242_vm8, %v243_v9, %v241_v12 }
 0x1eb   :  { %v245_v14 = vmul.f32 %v244_v13, %v237_v8 }
 0x1ed   :  { %v246_v18 = vsel %vm41_vm9, %v844_v5, %v245_v14 }
 0x1ee   :  { %552 = vmatmul.mubr.msk.f32.vlgmr.msra.gmra.mrb[0].mxu0 %vm255_vm10, %v246_v18 }
 0x1ef   :  { %624 = vmatpush3.bf16.msra.mxu0 %v623_v15  ;;  %586 = vmatprep.mubr.msk.f32.mxu0 %vm681_vm0, %v682_v4  ;;  %v450_v4 = vld [vmem:[%s938_s6 + $0x138] sm:$0xff]  ;;  %s433_s6 = sshll.u32 %s683_s13, 4  ;;  %s434_s6 = int_to_ptr.vmem [resolvable:$true] %s433_s6 }
 0x1f0   :  { %625 = vmatprep.subr.bf16.mxu0 %v680_v2  ;;  %v632_v24 = vpack.c.bf16 %v450_v4, %v449_v23  ;;  %s656_s2 = scalar_lea.vmem %s434_s6, 32  ;;  %p661_p1 = scmp.lt.s32.totalorder %s434_s6, %s434_s6 }
 0x1f1   :  { %p657_p0 = scmp.ne.s32.totalorder %s434_s6, %s656_s2  ;;  %p662_p2 = scmp.lt.s32.totalorder %s656_s2, %s656_s2 }
 0x1f3   :  { %627 = vmatpush3.bf16.msra.mxu0 %v626_v19  ;;  %p663_p3 = por %p662_p2, %p661_p1 }
 0x1f4   :  { %628 = vmatprep.subr.bf16.mxu0 %v680_v2 }
 0x1f5   :  { %p664_p4 = pnand %p663_p3, %p657_p0 }
 0x1f7   :  { %630 = vmatpush3.bf16.msra.mxu0 %v629_v22 }
 0x1f8   :  { %631 = vmatprep.subr.bf16.mxu0 %v680_v2 }
 0x1fb   :  { %633 = vmatpush3.bf16.msra.mxu0 %v632_v24 }
 0x1fc   :  { %634 = vmatprep.subr.bf16.mxu0 %v680_v2 }
 0x1ff   :  { %636 = vmatpush3.bf16.msra.mxu0 %v635_v27 }
 0x200   :  { %637 = vmatprep.subr.bf16.mxu0 %v680_v2 }
 0x203   :  { %639 = vmatpush3.bf16.msra.mxu0 %v638_v30 }
 0x204   :  { %640 = vmatprep.subr.bf16.mxu0 %v680_v2 }
 0x207   :  { %642 = vmatpush3.bf16.msra.mxu0 %v641_v35 }
 0x208   :  { %643 = vmatprep.subr.bf16.mxu0 %v680_v2  ;;  %v351_v2 = vrot.slane %v838_v46, %v253_v39 }
 0x20b   :  { %645 = vmatpush3.bf16.msra.mxu0 %v644_v38 }
 0x2c1   :  { %v325_v41 = vpop.f32.mrb[0].mxu0 }
 0x2c2   :  { %v326_v42 = vadd.f32 %v325_v41, %v254_v40  ;;  %v553_v43 = vpop.f32.mrb[1].mxu0 }
 0x2c4   :  { %v329_v44 = vmul.f32 0.2, %v326_v42 }
 0x2c6   :  { %v330_v45 = vmax.f32 %v326_v42, %v329_v44 }
 0x2c8   :  { %587 = vmatmul.mubr.f32.vlgmr.msra.gmra.mrb[2].mxu0 %v330_v45 }
 0x39b   :  { %v418_v47 = vpop.f32.mrb[2].mxu0 }
 0x39c   :  { %v419_v48 = vadd.f32 %v418_v47, %v351_v2  ;;  %v588_v49 = vpop.f32.mrb[3].mxu0 }
 0x39e   :  { %v422_v50 = vmul.f32 0.2, %v419_v48 }
 0x3a0   :  { %v423_v51 = vmax.f32 %v419_v48, %v422_v50 }
 0x3a2   :  { %v424_v31 = vsel %vm38_vm11, %v423_v51, %v844_v5 }
 0x3a3   :  { %426 = vst.msk [vmem:[#allocation2] sm:$0x3] %vm425_vm12, %v424_v31 }
 0x3a4   :  { %667 = shalt.err (!%p664_p4)
}
 0x3a5   :  { %s668_s15 = scalar_lea.hbm %s942_s10, 32 }
 0x3a6   :  { %p669_p5 = scmp.ne.s32.totalorder %s942_s10, %s668_s15  ;;  %p672_p6 = scmp.lt.u32.totalorder %s668_s15, %s942_s10 }
 0x3a8   :  { %p674_p7 = pnand %p672_p6, %p669_p5 }
 0x3aa   :  { %677 = shalt.err (!%p674_p7)
}
 0x3ab   :  { %436 = dma.vmem_to_hbm [thread:$0]  %s434_s6, 32, %s942_s10, [#allocation3]  }
 0x3ac   :  { %678 = dma.done.wait [#allocation3], 32  }
 0x3ad   :  { %679 = vsyncadd [#allocation3], 4294967264 }
 0x3ae   :  { %440 = vsyncpa [#allocation3], 1 }

</bundles_post_ra>
